<compile_context>
chip_gen: v6e
topology: v6e:2x2x1
jax: 0.10.0
libtpu: 0.0.40
codegen_flags: <defaults>
</compile_context>

<pallas_src>
import jax
import jax.numpy as jnp
from jax.experimental import pallas as pl
from jax.experimental.pallas import tpu as pltpu

# Logical (PyTorch) hidden sizes and their lane-padded (multiple-of-128) sizes.
H0, H1 = 250, 100
H0_PAD, H1_PAD = 256, 128


def _round_up(x, m):
    return ((x + m - 1) // m) * m


def _mlp_kernel(x_ref, w0_ref, b0_ref, w1_ref, b1_ref, w2_ref, b2_ref, out_ref):
    """Fused 3-layer MLP on one batch tile.

    x_ref  : [TILE_B, F]       f32   (cast to bf16 in-kernel)
    w0_ref : [F, H0_PAD]       bf16    b0_ref : [1, H0_PAD] f32
    w1_ref : [H0_PAD, H1_PAD]  bf16    b1_ref : [1, H1_PAD] f32
    w2_ref : [1, H1_PAD]       f32     b2_ref : [1, 1]      f32 (SMEM scalar)
    out_ref: [TILE_B, 1]       f32     logits column
    """
    xb = x_ref[...].astype(jnp.bfloat16)

    # layer 0: Linear(F, 250) + ReLU   (MXU, f32 accumulate; fused bias+ReLU+cast)
    h0 = jnp.maximum(
        jnp.dot(xb, w0_ref[...], preferred_element_type=jnp.float32) + b0_ref[...],
        0.0,
    ).astype(jnp.bfloat16)

    # layer 1: Linear(250, 100) + ReLU  (keep h1 in f32 for the final layer)
    h1 = jnp.maximum(
        jnp.dot(h0, w1_ref[...], preferred_element_type=jnp.float32) + b1_ref[...],
        0.0,
    )

    # layer 2: Linear(100, 1) as a VPU multiply + lane reduction.  Avoids any
    # MXU/relayout transpose of the [TILE_B, 128] h1 tile; padded lanes of w2
    # are zero so they contribute nothing.
    z = jnp.sum(h1 * w2_ref[...], axis=-1, keepdims=True)
    out_ref[...] = (z + b2_ref[0, 0]).astype(out_ref.dtype)


def discriminator_mlp_forward(x, prepared_params, *, tile_b=2048):
    """x: [B, n_features] float32.  prepared_params: output of prepare_params().
    Returns [B, 1] float32 logits."""
    B, F = x.shape
    w0, b0 = prepared_params["w0"], prepared_params["b0"]
    w1, b1 = prepared_params["w1"], prepared_params["b1"]
    w2, b2 = prepared_params["w2"], prepared_params["b2"]

    # Tile choice:
    #  * tiny B: one sublane-aligned tile (overhead-dominated regime anyway).
    #  * otherwise: lane-aligned tile capped both by tile_b and by ceil(B/2) so
    #    the grid has >= 2 steps -> "parallel" batch axis can use both v7x TCs.
    if B <= 256:
        b_tile = _round_up(B, 8)
    else:
        b_tile = max(128, min(tile_b, _round_up(pl.cdiv(B, 2), 128)))
    grid = (pl.cdiv(B, b_tile),)

    flops = 2 * B * (F * H0_PAD + H0_PAD * H1_PAD + H1_PAD)
    bytes_accessed = (x.size * 4 + w0.size * 2 + w1.size * 2
                      + b0.size * 4 + b1.size * 4 + w2.size * 4 + b2.size * 4
                      + B * 4)

    out = pl.pallas_call(
        _mlp_kernel,
        out_shape=jax.ShapeDtypeStruct((B, 1), jnp.float32),
        grid=grid,
        in_specs=[
            pl.BlockSpec((b_tile, F), lambda i: (i, 0)),        # x: tiled over batch
            pl.BlockSpec((F, H0_PAD), lambda i: (0, 0)),        # weights/biases: VMEM-resident
            pl.BlockSpec((1, H0_PAD), lambda i: (0, 0)),
            pl.BlockSpec((H0_PAD, H1_PAD), lambda i: (0, 0)),
            pl.BlockSpec((1, H1_PAD), lambda i: (0, 0)),
            pl.BlockSpec((1, H1_PAD), lambda i: (0, 0)),
            pl.BlockSpec(memory_space=pltpu.MemorySpace.SMEM),  # scalar output bias
        ],
        out_specs=pl.BlockSpec((b_tile, 1), lambda i: (i, 0)),
        compiler_params=pltpu.CompilerParams(
            dimension_semantics=("parallel",)),                 # shard batch tiles across TCs
        cost_estimate=pl.CostEstimate(
            flops=flops, transcendentals=0, bytes_accessed=bytes_accessed),
    )(x, w0, b0, w1, b1, w2, b2)

    return out


def init_params(key, n_features):
    """PyTorch nn.Linear default init (U[-1/sqrt(fan_in), +1/sqrt(fan_in)]).
    Weights stored transposed to [in, out]; biases as [1, out] rows (float32)."""
    dims = [(n_features, H0), (H0, H1), (H1, 1)]
    params = {}
    for i, (fan_in, fan_out) in enumerate(dims):
        key, kw, kb = jax.random.split(key, 3)
        bound = 1.0 / jnp.sqrt(jnp.float32(fan_in))
        params[f"w{i}"] = jax.random.uniform(
            kw, (fan_in, fan_out), jnp.float32, minval=-bound, maxval=bound)
        params[f"b{i}"] = jax.random.uniform(
            kb, (1, fan_out), jnp.float32, minval=-bound, maxval=bound)
    return params


def prepare_params(params):
    """Zero-pad hidden dims to lane multiples (250->256, 100->128), cast the two
    matmul weights to bf16 (accumulation stays f32 in-kernel), keep biases and
    the tiny final-layer weight row in f32.  Zero padding is numerically inert:
    ReLU(0+0)=0 and zero rows/lanes contribute nothing."""
    w0 = jnp.pad(params["w0"], ((0, 0), (0, H0_PAD - H0))).astype(jnp.bfloat16)
    b0 = jnp.pad(params["b0"], ((0, 0), (0, H0_PAD - H0)))
    w1 = jnp.pad(params["w1"], ((0, H0_PAD - H0), (0, H1_PAD - H1))).astype(jnp.bfloat16)
    b1 = jnp.pad(params["b1"], ((0, 0), (0, H1_PAD - H1)))
    w2 = jnp.pad(params["w2"], ((0, H1_PAD - H1), (0, 0))).T                  # [1, H1_PAD] f32
    b2 = params["b2"].reshape(1, 1)
    return {"w0": w0, "b0": b0, "w1": w1, "b1": b1, "w2": w2, "b2": b2}


def _reference_forward(x, prep):
    """Pure-JAX reference mirroring the kernel's bf16-input / f32-accumulate math.
    NOTE: h0/h1 are re-quantized to bf16 between the first two layers, so results
    differ from a true fp32 PyTorch forward at the ~1e-2 relative level."""
    xb = x.astype(jnp.bfloat16)
    h0 = jnp.maximum(
        jnp.dot(xb, prep["w0"], preferred_element_type=jnp.float32) + prep["b0"], 0.0)
    h1 = jnp.maximum(
        jnp.dot(h0.astype(jnp.bfloat16), prep["w1"],
                preferred_element_type=jnp.float32) + prep["b1"], 0.0)
    return jnp.sum(h1 * prep["w2"], axis=-1, keepdims=True) + prep["b2"][0, 0]


if __name__ == "__main__":
    key = jax.random.PRNGKey(0)
    n_features = 16

    key, kp = jax.random.split(key)
    params = init_params(kp, n_features)
    prep = prepare_params(params)

    # B=2:   tiny single (ragged) tile, block larger than the array.
    # B=640: 2-step grid with a ragged last block.
    # B=5000: exercises the tile_b cap (grid of 3 tiles of 2048).
    for B in (2, 640, 5000):
        key, kx = jax.random.split(key)
        x = jax.random.normal(kx, (B, n_features), jnp.float32)

        out = jax.block_until_ready(discriminator_mlp_forward(x, prep))
        ref = _reference_forward(x, prep)

        assert out.shape == (B, 1)
        assert jnp.allclose(out, ref, atol=2e-4, rtol=1e-3), (
            f"mismatch at B={B}: max|d|={float(jnp.max(jnp.abs(out - ref)))}")

    print("KERNEL_OK")
</pallas_src>

<mosaic_0001>
module attributes {stable_mosaic.version = 11 : i64} {
  func.func @_mlp_kernel(%arg0: i32, %arg1: memref<8x16xf32, #tpu.memory_space<vmem>>, %arg2: memref<16x256xbf16, #tpu.memory_space<vmem>>, %arg3: memref<1x256xf32, #tpu.memory_space<vmem>>, %arg4: memref<256x128xbf16, #tpu.memory_space<vmem>>, %arg5: memref<1x128xf32, #tpu.memory_space<vmem>>, %arg6: memref<1x128xf32, #tpu.memory_space<vmem>>, %arg7: memref<1x1xf32, #tpu.memory_space<smem>>, %arg8: memref<8x1xf32, #tpu.memory_space<vmem>>) attributes {dimension_semantics = [#tpu.dimension_semantics<parallel>], iteration_bounds = array<i64: 1>, scalar_prefetch = 0 : i64, scratch_operands = 0 : i64, tpu.core_type = #tpu.core_type<tc>, window_params = [{transform_indices = @transform_0, window_bounds = array<i64: 8, 16>}, {pipeline_mode = #tpu.pipeline_mode<synchronous>, transform_indices = @transform_1, window_bounds = array<i64: 16, 256>}, {pipeline_mode = #tpu.pipeline_mode<synchronous>, transform_indices = @transform_2, window_bounds = array<i64: 1, 256>}, {pipeline_mode = #tpu.pipeline_mode<synchronous>, transform_indices = @transform_3, window_bounds = array<i64: 256, 128>}, {pipeline_mode = #tpu.pipeline_mode<synchronous>, transform_indices = @transform_4, window_bounds = array<i64: 1, 128>}, {pipeline_mode = #tpu.pipeline_mode<synchronous>, transform_indices = @transform_5, window_bounds = array<i64: 1, 128>}, {transform_indices = @transform_6, window_bounds = array<i64: 1, 1>}, {transform_indices = @transform_7, window_bounds = array<i64: 8, 1>}]} {
    %c0 = arith.constant 0 : index
    %c0_0 = arith.constant 0 : index
    %0 = vector.load %arg1[%c0, %c0_0] : memref<8x16xf32, #tpu.memory_space<vmem>>, vector<8x16xf32>
    %1 = arith.truncf %0 : vector<8x16xf32> to vector<8x16xbf16>
    %c0_1 = arith.constant 0 : index
    %c0_2 = arith.constant 0 : index
    %2 = vector.load %arg2[%c0_1, %c0_2] : memref<16x256xbf16, #tpu.memory_space<vmem>>, vector<16x256xbf16>
    %cst = arith.constant dense<0.000000e+00> : vector<8x256xf32>
    %3 = tpu.matmul %1, %2, %cst {dimension_numbers = #tpu.dot_dimension_numbers<[1], [0], [0], [1], [0, 0, 1, 1], [], []>} : vector<8x16xbf16>, vector<16x256xbf16>, vector<8x256xf32> -> vector<8x256xf32>
    %c0_3 = arith.constant 0 : index
    %c0_4 = arith.constant 0 : index
    %4 = vector.load %arg3[%c0_3, %c0_4] : memref<1x256xf32, #tpu.memory_space<vmem>>, vector<1x256xf32>
    %5 = vector.broadcast %4 : vector<1x256xf32> to vector<8x256xf32>
    %6 = arith.addf %3, %5 : vector<8x256xf32>
    %cst_5 = arith.constant 0.000000e+00 : f32
    %7 = vector.broadcast %cst_5 : f32 to vector<8x256xf32>
    %8 = arith.maximumf %6, %7 : vector<8x256xf32>
    %9 = arith.truncf %8 : vector<8x256xf32> to vector<8x256xbf16>
    %c0_6 = arith.constant 0 : index
    %c0_7 = arith.constant 0 : index
    %10 = vector.load %arg4[%c0_6, %c0_7] : memref<256x128xbf16, #tpu.memory_space<vmem>>, vector<256x128xbf16>
    %cst_8 = arith.constant dense<0.000000e+00> : vector<8x128xf32>
    %11 = tpu.matmul %9, %10, %cst_8 {dimension_numbers = #tpu.dot_dimension_numbers<[1], [0], [0], [1], [0, 0, 1, 1], [], []>} : vector<8x256xbf16>, vector<256x128xbf16>, vector<8x128xf32> -> vector<8x128xf32>
    %c0_9 = arith.constant 0 : index
    %c0_10 = arith.constant 0 : index
    %12 = vector.load %arg5[%c0_9, %c0_10] : memref<1x128xf32, #tpu.memory_space<vmem>>, vector<1x128xf32>
    %13 = vector.broadcast %12 : vector<1x128xf32> to vector<8x128xf32>
    %14 = arith.addf %11, %13 : vector<8x128xf32>
    %cst_11 = arith.constant 0.000000e+00 : f32
    %15 = vector.broadcast %cst_11 : f32 to vector<8x128xf32>
    %16 = arith.maximumf %14, %15 : vector<8x128xf32>
    %c0_12 = arith.constant 0 : index
    %c0_13 = arith.constant 0 : index
    %17 = vector.load %arg6[%c0_12, %c0_13] : memref<1x128xf32, #tpu.memory_space<vmem>>, vector<1x128xf32>
    %18 = vector.broadcast %17 : vector<1x128xf32> to vector<8x128xf32>
    %19 = arith.mulf %16, %18 : vector<8x128xf32>
    %cst_14 = arith.constant dense<0.000000e+00> : vector<8xf32>
    %20 = vector.multi_reduction <add>, %19, %cst_14 [1] : vector<8x128xf32> to vector<8xf32>
    %21 = vector.shape_cast %20 : vector<8xf32> to vector<8x1xf32>
    %c0_15 = arith.constant 0 : index
    %c0_16 = arith.constant 0 : index
    %22 = memref.load %arg7[%c0_15, %c0_16] : memref<1x1xf32, #tpu.memory_space<smem>>
    %23 = vector.broadcast %22 : f32 to vector<8x1xf32>
    %24 = arith.addf %21, %23 : vector<8x1xf32>
    %c0_17 = arith.constant 0 : index
    %c0_18 = arith.constant 0 : index
    %25 = vector.load %arg8[%c0_17, %c0_18] : memref<8x1xf32, #tpu.memory_space<vmem>>, vector<8x1xf32>
    tpu.vector_store %arg8[%c0_17, %c0_18], %24 {strides = array<i32>} : memref<8x1xf32, #tpu.memory_space<vmem>>, vector<8x1xf32>,
    return
  }
  func.func @transform_0(%arg0: i32) -> (i32, i32) {
    %c0_i32 = arith.constant 0 : i32
    %c0_i32_0 = arith.constant 0 : i32
    return %arg0, %c0_i32 : i32, i32
  }
  func.func @transform_1(%arg0: i32) -> (i32, i32) {
    %c0_i32 = arith.constant 0 : i32
    %c0_i32_0 = arith.constant 0 : i32
    %c0_i32_1 = arith.constant 0 : i32
    return %c0_i32, %c0_i32_0 : i32, i32
  }
  func.func @transform_2(%arg0: i32) -> (i32, i32) {
    %c0_i32 = arith.constant 0 : i32
    %c0_i32_0 = arith.constant 0 : i32
    %c0_i32_1 = arith.constant 0 : i32
    return %c0_i32, %c0_i32_0 : i32, i32
  }
  func.func @transform_3(%arg0: i32) -> (i32, i32) {
    %c0_i32 = arith.constant 0 : i32
    %c0_i32_0 = arith.constant 0 : i32
    %c0_i32_1 = arith.constant 0 : i32
    return %c0_i32, %c0_i32_0 : i32, i32
  }
  func.func @transform_4(%arg0: i32) -> (i32, i32) {
    %c0_i32 = arith.constant 0 : i32
    %c0_i32_0 = arith.constant 0 : i32
    %c0_i32_1 = arith.constant 0 : i32
    return %c0_i32, %c0_i32_0 : i32, i32
  }
  func.func @transform_5(%arg0: i32) -> (i32, i32) {
    %c0_i32 = arith.constant 0 : i32
    %c0_i32_0 = arith.constant 0 : i32
    %c0_i32_1 = arith.constant 0 : i32
    return %c0_i32, %c0_i32_0 : i32, i32
  }
  func.func @transform_6(%arg0: i32) -> (i32, i32) {
    %c0_i32 = arith.constant 0 : i32
    %c0_i32_0 = arith.constant 0 : i32
    %c0_i32_1 = arith.constant 0 : i32
    return %c0_i32, %c0_i32_0 : i32, i32
  }
  func.func @transform_7(%arg0: i32) -> (i32, i32) {
    %c0_i32 = arith.constant 0 : i32
    %c0_i32_0 = arith.constant 0 : i32
    return %arg0, %c0_i32 : i32, i32
  }
}

</mosaic_0001>

<bundles_post_ra>
// kernel: tpu_custom_call.1
= control target key start
LH: loop header
LB: loop body
LE: loop exit
PB: predicated region body
PF: predicated region fallthrough
CT: control target
= control target key end

     0   :  { %13 = vsyncpa [#allocation4], 0  ;;  %s549_s0 = inlined_call_operand.vmem [shape: f32[2,16], index: 0, kind: input, shape index: {}]   ;;  %s550_s1 = inlined_call_operand.hbm [shape: bf16[16,256], index: 1, kind: input, shape index: {}]   ;;  %s551_s2 = inlined_call_operand.vmem [shape: f32[1,256], index: 2, kind: input, shape index: {}]   ;;  %s552_s3 = inlined_call_operand.hbm [shape: bf16[256,128], index: 3, kind: input, shape index: {}]   ;;  %s553_s4 = inlined_call_operand.vmem [shape: f32[1,128], index: 4, kind: input, shape index: {}]   ;;  %s554_s5 = inlined_call_operand.vmem [shape: f32[1,128], index: 5, kind: input, shape index: {}]   ;;  %s555_s6 = inlined_call_operand.<no memory space> [shape: f32[1,1], index: 6, kind: input, shape index: {}]   ;;  %s556_s7 = inlined_call_operand.vmem [shape: f32[2,1], index: 7, kind: output, shape index: {}]  }
   0x1   :  { %14 = vsyncpa [#allocation6], 0  ;;  %s478_s24 = smov [#allocation3]  }
   0x2   :  { %s22_s25 = sshll.u32 %s478_s24, 4  ;;  %s23_s25 = int_to_ptr.vmem [resolvable:$true] %s22_s25 }
   0x3   :  { %s442_s26 = scalar_lea.vmem %s23_s25, 256  ;;  %p447_p1 = scmp.lt.s32.totalorder %s23_s25, %s23_s25 }
   0x4   :  { %p443_p0 = scmp.ne.s32.totalorder %s23_s25, %s442_s26  ;;  %p448_p2 = scmp.lt.s32.totalorder %s442_s26, %s442_s26 }
   0x6   :  { %p449_p3 = por %p448_p2, %p447_p1 }
   0x8   :  { %p450_p4 = pnand %p449_p3, %p443_p0 }
   0xa   :  { %453 = shalt.err (!%p450_p4)
}
   0xb   :  { %s479_s27 = smov 128   ;;  %s480_s28 = smov 8  }
   0xc   :  { %28 = dma.hbm_to_vmem [thread:$0]  %s550_s1, 256, %s23_s25, [#allocation4], %s479_s27, %s479_s27, %s480_s28  }
   0xd   :  { %s481_s8 = smov [#allocation5]  }
   0xe   :  { %s36_s9 = sshll.u32 %s481_s8, 4  ;;  %s37_s9 = int_to_ptr.vmem [resolvable:$true] %s36_s9 }
   0xf   :  { %s462_s10 = scalar_lea.vmem %s37_s9, 2048  ;;  %p467_p6 = scmp.lt.s32.totalorder %s37_s9, %s37_s9 }
  0x10   :  { %p463_p5 = scmp.ne.s32.totalorder %s37_s9, %s462_s10  ;;  %p468_p7 = scmp.lt.s32.totalorder %s462_s10, %s462_s10 }
  0x12   :  { %p469_p8 = por %p468_p7, %p467_p6 }
  0x14   :  { %p470_p9 = pnand %p469_p8, %p463_p5 }
  0x16   :  { %473 = shalt.err (!%p470_p9)
}
  0x17   :  { %s482_s11 = smov 64   ;;  %s483_s12 = smov 4  }
  0x18   :  { %42 = dma.hbm_to_vmem [thread:$0]  %s552_s3, 2048, %s37_s9, [#allocation6], %s482_s11, %s482_s11, %s483_s12  }
  0x19   :  { %474 = dma.done.wait [#allocation4], 256  }
  0x1a   :  { %475 = vsyncadd [#allocation4], 4294967040 }
  0x1b   :  { %476 = dma.done.wait [#allocation6], 2048  }
  0x1c   :  { %477 = vsyncadd [#allocation6], 4294965248  ;;  %v484_v0 = vmov 0   ;;  %v415_v1 = vld [vmem:[#allocation3 + $0x4] ss:$8 sps:$4 sm:$0xff]   ;;  %vm82_vm0 = vcmask 130048   ;;  %v62_v21 = vlaneseq  ;;  %v318_v48 = vstv %s555_s6 }
  0x1d   :  { %118 = vmatprep.mubr.bf16.mxu0 %v484_v0  ;;  %v417_v2 = vld [vmem:[#allocation3] ss:$8 sps:$4 sm:$0xff]   ;;  %100 = vmatprep.subr.bf16.mxu0 %v415_v1  ;;  %v422_v9 = vld [vmem:[#allocation5 + $0x68] sm:$0xff]   ;;  %v424_v11 = vld [vmem:[#allocation5 + $0x60] sm:$0xff]   ;;  %vm320_vm1 = vcmask 7168  }
  0x1e   :  { %v56_v3 = vld [vmem:[%s549_s0] sm:$0xff]  ;;  %v418_v5 = vld [vmem:[#allocation5 + $0x78] sm:$0xff]   ;;  %101 = vmatpush1.bf16.msra.mxu0 %v417_v2  ;;  %v423_v10 = vld [vmem:[#allocation5 + $0x28] sm:$0xff]   ;;  %v63_v22 = vshrl.u32 %v62_v21, 7 }
  0x1f   :  { %v57_v4 = vpack.c.bf16 %v56_v3, %v56_v3  ;;  %v419_v6 = vld [vmem:[#allocation5 + $0x38] sm:$0xff]   ;;  %386 = vmatprep.subr.bf16.mxu1 %v418_v5  ;;  %v420_v7 = vld [vmem:[#allocation5 + $0x70] sm:$0xff]   ;;  %v425_v12 = vld [vmem:[#allocation5 + $0x20] sm:$0xff]  }
  0x20   :  { %387 = vmatpush3.bf16.msra.mxu1 %v419_v6  ;;  %v421_v8 = vld [vmem:[#allocation5 + $0x30] sm:$0xff]   ;;  %v426_v13 = vld [vmem:[#allocation5 + $0x58] sm:$0xff]   ;;  %v430_v17 = vld [vmem:[#allocation5 + $0x48] sm:$0xff]   ;;  %v64_v23 = vsub.s32 0, %v63_v22  ;;  %v68_v25 = vsub.s32 1, %v63_v22 }
  0x21   :  { %367 = vmatmul.mubr.msk.bf16.vlgmr.msra.gmra.mxu0 %vm82_vm0, %v57_v4  ;;  %388 = vmatprep.subr.bf16.mxu1 %v420_v7  ;;  %v427_v14 = vld [vmem:[#allocation5 + $0x18] sm:$0xff]   ;;  %v428_v15 = vld [vmem:[#allocation5 + $0x50] sm:$0xff]   ;;  %v431_v18 = vld [vmem:[#allocation5 + $0x8] sm:$0xff]  }
  0x22   :  { %v429_v16 = vld [vmem:[#allocation5 + $0x10] sm:$0xff]   ;;  %v432_v19 = vld [vmem:[#allocation5 + $0x40] sm:$0xff]  }
  0x23   :  { %v433_v20 = vld [vmem:[#allocation5] sm:$0xff]   ;;  %v60_v24 = vld [vmem:[%s551_s2] sm:$0x3] }
  0x24   :  { %389 = vmatpush3.bf16.msra.mxu1 %v421_v8  ;;  %v65_v26 = vrot.slane %v60_v24, %v64_v23  ;;  %v69_v27 = vrot.slane %v60_v24, %v68_v25  ;;  %v368_v40 = vld [vmem:[%s553_s4] ss:$0 sm:$0xff] }
  0x25   :  { %390 = vmatprep.subr.bf16.mxu1 %v422_v9  ;;  %v385_v45 = vld [vmem:[%s554_s5] ss:$0 sm:$0xff] }
  0x28   :  { %391 = vmatpush3.bf16.msra.mxu1 %v423_v10 }
  0x29   :  { %392 = vmatprep.subr.bf16.mxu1 %v424_v11 }
  0x2c   :  { %393 = vmatpush3.bf16.msra.mxu1 %v425_v12 }
  0x2d   :  { %394 = vmatprep.subr.bf16.mxu1 %v426_v13 }
  0x30   :  { %395 = vmatpush3.bf16.msra.mxu1 %v427_v14 }
  0x31   :  { %396 = vmatprep.subr.bf16.mxu1 %v428_v15 }
  0x34   :  { %397 = vmatpush3.bf16.msra.mxu1 %v429_v16 }
  0x35   :  { %398 = vmatprep.subr.bf16.mxu1 %v430_v17 }
  0x38   :  { %399 = vmatpush3.bf16.msra.mxu1 %v431_v18 }
  0x39   :  { %400 = vmatprep.subr.bf16.mxu1 %v432_v19 }
  0x3c   :  { %401 = vmatpush3.bf16.msra.mxu1 %v433_v20 }
  0xe1   :  { %v120_v28 = vpop.f32.mrf.mxu0 }
  0xe2   :  { %v121_v29 = vadd.f32 %v120_v28, %v65_v26 }
  0xe3   :  { %v122_v30 = vpop.f32.mrf.mxu0 }
  0xe4   :  { %v123_v31 = vadd.f32 %v122_v30, %v69_v27  ;;  %v127_v32 = vmax.f32 %v121_v29, 0.0 }
  0xe5   :  { %v124_v33 = vpop.f32.mrf.mxu0 }
  0xe6   :  { %v128_v34 = vmax.f32 %v123_v31, 0.0  ;;  %v129_v37 = vpack.c.bf16 %v127_v32, %v127_v32 }
  0xe7   :  { %v125_v35 = vpop.f32.mrf.mxu0 }
  0xe8   :  { %v130_v36 = vpack.c.bf16 %v128_v34, %v128_v34 }
  0xea   :  { %298 = vmatprep.mubr.bf16.mxu1 %v130_v36 }
  0xeb   :  { %299 = vmatmul.mubr.bf16.vlgmr.msra.gmra.mxu1 %v129_v37 }
 0x1ab   :  { %v402_v38 = vpop.f32.mrf.mxu1 }
 0x1ad   :  { %v403_v39 = vpop.f32.mrf.mxu1 }
 0x1ae   :  { %v404_v41 = vadd.f32 %v403_v39, %v402_v38 }
 0x1af   :  { %v405_v42 = vpop.f32.mrf.mxu1 }
 0x1b0   :  { %v301_v43 = vadd.f32 %v404_v41, %v368_v40 }
 0x1b1   :  { %v406_v44 = vpop.f32.mrf.mxu1 }
 0x1b2   :  { %v306_v46 = vmax.f32 %v301_v43, 0.0 }
 0x1b4   :  { %v314_v47 = vmul.f32 %v385_v45, %v306_v46 }
 0x1b6   :  { %315 = vadd.xlane.f32.xlu0 %v314_v47 }
 0x23f   :  { %v316_v49 = vpop.xlane.xlu0 %315 }
 0x240   :  { %v319_v50 = vadd.f32 %v318_v48, %v316_v49 }
 0x242   :  { %321 = vst.msk [vmem:[#allocation7] sm:$0xff] %vm320_vm1, %v319_v50 }
 0x249   :  { %v340_v51 = vld [vmem:[#allocation7] sm:$0x3] }
 0x24a   :  { %341 = vst [vmem:[%s556_s7] sm:$0x3] %v340_v51 }
 0x24b   :  { %359 = vsyncpa [#allocation4], 1 }
 0x24c   :  { %360 = vsyncpa [#allocation6], 1 }

</bundles_post_ra>
